<compile_context>
chip_gen: v5e
topology: v5e:2x2
jax: 0.10.0
libtpu: 0.0.40
codegen_flags: <defaults>
</compile_context>

<pallas_src>
import jax
import jax.numpy as jnp
from jax.experimental import pallas as pl
from jax.experimental.pallas import tpu as pltpu


def _round_up(x, m):
    return ((x + m - 1) // m) * m


def net_kernel(x_ref, w1_ref, b1_ref, w2_ref, b2_ref, out_ref):
    # x_ref:  (TM, 75)  bf16 flattened NCHW rows (whole 5x5 image per row)
    # w1_ref: (75, 16)  bf16 conv weight, transposed so matmul gives (TM, 16)
    # b1_ref: (1, 16)   f32
    # w2_ref: (16, 4)   f32 linear weight, transposed
    # b2_ref: (1, 4)    f32
    # out_ref:(TM, 4)   f32
    # Conv2d(3,16,5) on a 5x5 input == matmul over flattened (C,KH,KW),
    # bf16 inputs with f32 accumulation on the MXU.
    h = jnp.dot(x_ref[...], w1_ref[...], preferred_element_type=jnp.float32)
    # bias + ReLU in f32 (v5e VPU has no bf16 path)
    h = jnp.maximum(h + b1_ref[...], 0.0)
    # Linear(16, 4), tiny f32 matmul
    out_ref[...] = (
        jnp.dot(h, w2_ref[...], preferred_element_type=jnp.float32)
        + b2_ref[...]
    )


def net_forward(x_nchw, w1, b1, w2, b2, *, tm=1024):
    """x_nchw: (N, 3, 5, 5) float32. Returns (N, 4) float32."""
    n, c, kh, kw = x_nchw.shape
    k = c * kh * kw  # 75

    # Glue: flatten NCHW -> (N, C*KH*KW); matches W1.reshape(16, 75) ordering.
    # Cast the bandwidth-dominant operands to bf16; keep biases / w2 in f32.
    x_flat = x_nchw.reshape(n, k).astype(jnp.bfloat16)       # (N, 75) bf16
    w1_t = w1.reshape(16, k).T.astype(jnp.bfloat16)           # (75, 16) bf16
    w2_t = w2.T.astype(jnp.float32)                           # (16, 4)  f32
    b1_row = b1.reshape(1, 16).astype(jnp.float32)
    b2_row = b2.reshape(1, 4).astype(jnp.float32)

    # Row tile: large for DMA pipelining, but never bigger than (8-aligned) N.
    tm_eff = min(tm, _round_up(n, 8))
    n_pad = _round_up(n, tm_eff)
    if n_pad != n:
        # Pad the tail tile with zero rows; they are sliced off after the call.
        x_flat = jnp.pad(x_flat, ((0, n_pad - n), (0, 0)))

    grid = (n_pad // tm_eff,)

    out = pl.pallas_call(
        net_kernel,
        out_shape=jax.ShapeDtypeStruct((n_pad, 4), jnp.float32),
        grid=grid,
        in_specs=[
            # x: tiled over the batch (double-buffered by Pallas).
            pl.BlockSpec((tm_eff, k), lambda i: (i, 0)),
            # weights / biases: resident in VMEM across all grid steps.
            pl.BlockSpec((k, 16), lambda i: (0, 0)),
            pl.BlockSpec((1, 16), lambda i: (0, 0)),
            pl.BlockSpec((16, 4), lambda i: (0, 0)),
            pl.BlockSpec((1, 4), lambda i: (0, 0)),
        ],
        out_specs=pl.BlockSpec((tm_eff, 4), lambda i: (i, 0)),
        compiler_params=pltpu.CompilerParams(
            dimension_semantics=("parallel",)),
    )(x_flat, w1_t, b1_row, w2_t, b2_row)

    return out[:n]


def net_forward_ref(x_nchw, w1, b1, w2, b2):
    """Pure-JAX f32 reference of the PyTorch forward (for verification)."""
    n = x_nchw.shape[0]
    conv = jnp.einsum("nchw,ochw->no", x_nchw, w1) + b1  # conv out is 1x1
    h = jax.nn.relu(conv).reshape(n, -1)
    return h @ w2.T + b2


if __name__ == "__main__":
    key = jax.random.PRNGKey(0)
    k_x, k_w1, k_b1, k_w2, k_b2 = jax.random.split(key, 5)

    N = 2
    # Input implied by the module: (N, 3, 5, 5)
    x = jax.random.normal(k_x, (N, 3, 5, 5), dtype=jnp.float32)

    # Deterministic synthetic parameters (shapes from __init__):
    # Conv2d(3, 16, 5): weight (16, 3, 5, 5), bias (16,)
    fan_in_conv = 3 * 5 * 5
    bound1 = 1.0 / jnp.sqrt(fan_in_conv)
    w1 = jax.random.uniform(k_w1, (16, 3, 5, 5), jnp.float32, -bound1, bound1)
    b1 = jax.random.uniform(k_b1, (16,), jnp.float32, -bound1, bound1)
    # Linear(16, 4): weight.normal_(0, 0.1), bias default uniform(-1/sqrt(16),..)
    w2 = 0.1 * jax.random.normal(k_w2, (4, 16), dtype=jnp.float32)
    bound2 = 1.0 / jnp.sqrt(16.0)
    b2 = jax.random.uniform(k_b2, (4,), jnp.float32, -bound2, bound2)

    out = net_forward(x, w1, b1, w2, b2)
    out = jax.block_until_ready(out)

    ref = net_forward_ref(x, w1, b1, w2, b2)
    assert out.shape == (N, 4), out.shape
    # Tolerance loosened vs. the pure-f32 version because x / conv weight are
    # fed to the MXU in bf16 (accumulation stays f32).
    assert jnp.allclose(out, ref, atol=3e-2, rtol=3e-2), (out, ref)

    print("KERNEL_OK")
</pallas_src>

<mosaic_0001>
module attributes {stable_mosaic.version = 11 : i64} {
  func.func @net_kernel(%arg0: i32, %arg1: memref<8x75xbf16, #tpu.memory_space<vmem>>, %arg2: memref<75x16xbf16, #tpu.memory_space<vmem>>, %arg3: memref<1x16xf32, #tpu.memory_space<vmem>>, %arg4: memref<16x4xf32, #tpu.memory_space<vmem>>, %arg5: memref<1x4xf32, #tpu.memory_space<vmem>>, %arg6: memref<8x4xf32, #tpu.memory_space<vmem>>) attributes {dimension_semantics = [#tpu.dimension_semantics<parallel>], iteration_bounds = array<i64: 1>, scalar_prefetch = 0 : i64, scratch_operands = 0 : i64, tpu.core_type = #tpu.core_type<tc>, window_params = [{transform_indices = @transform_0, window_bounds = array<i64: 8, 75>}, {pipeline_mode = #tpu.pipeline_mode<synchronous>, transform_indices = @transform_1, window_bounds = array<i64: 75, 16>}, {pipeline_mode = #tpu.pipeline_mode<synchronous>, transform_indices = @transform_2, window_bounds = array<i64: 1, 16>}, {pipeline_mode = #tpu.pipeline_mode<synchronous>, transform_indices = @transform_3, window_bounds = array<i64: 16, 4>}, {pipeline_mode = #tpu.pipeline_mode<synchronous>, transform_indices = @transform_4, window_bounds = array<i64: 1, 4>}, {transform_indices = @transform_5, window_bounds = array<i64: 8, 4>}]} {
    %c0 = arith.constant 0 : index
    %c0_0 = arith.constant 0 : index
    %0 = vector.load %arg1[%c0, %c0_0] : memref<8x75xbf16, #tpu.memory_space<vmem>>, vector<8x75xbf16>
    %c0_1 = arith.constant 0 : index
    %c0_2 = arith.constant 0 : index
    %1 = vector.load %arg2[%c0_1, %c0_2] : memref<75x16xbf16, #tpu.memory_space<vmem>>, vector<75x16xbf16>
    %cst = arith.constant dense<0.000000e+00> : vector<8x16xf32>
    %2 = tpu.matmul %0, %1, %cst {dimension_numbers = #tpu.dot_dimension_numbers<[1], [0], [0], [1], [0, 0, 1, 1], [], []>} : vector<8x75xbf16>, vector<75x16xbf16>, vector<8x16xf32> -> vector<8x16xf32>
    %c0_3 = arith.constant 0 : index
    %c0_4 = arith.constant 0 : index
    %3 = vector.load %arg3[%c0_3, %c0_4] : memref<1x16xf32, #tpu.memory_space<vmem>>, vector<1x16xf32>
    %4 = vector.broadcast %3 : vector<1x16xf32> to vector<8x16xf32>
    %5 = arith.addf %2, %4 : vector<8x16xf32>
    %cst_5 = arith.constant 0.000000e+00 : f32
    %6 = vector.broadcast %cst_5 : f32 to vector<8x16xf32>
    %7 = arith.maximumf %5, %6 : vector<8x16xf32>
    %c0_6 = arith.constant 0 : index
    %c0_7 = arith.constant 0 : index
    %8 = vector.load %arg4[%c0_6, %c0_7] : memref<16x4xf32, #tpu.memory_space<vmem>>, vector<16x4xf32>
    %cst_8 = arith.constant dense<0.000000e+00> : vector<8x4xf32>
    %9 = tpu.matmul %7, %8, %cst_8 {dimension_numbers = #tpu.dot_dimension_numbers<[1], [0], [0], [1], [0, 0, 1, 1], [], []>} : vector<8x16xf32>, vector<16x4xf32>, vector<8x4xf32> -> vector<8x4xf32>
    %c0_9 = arith.constant 0 : index
    %c0_10 = arith.constant 0 : index
    %10 = vector.load %arg5[%c0_9, %c0_10] : memref<1x4xf32, #tpu.memory_space<vmem>>, vector<1x4xf32>
    %11 = vector.broadcast %10 : vector<1x4xf32> to vector<8x4xf32>
    %12 = arith.addf %9, %11 : vector<8x4xf32>
    %c0_11 = arith.constant 0 : index
    %c0_12 = arith.constant 0 : index
    %13 = vector.load %arg6[%c0_11, %c0_12] : memref<8x4xf32, #tpu.memory_space<vmem>>, vector<8x4xf32>
    tpu.vector_store %arg6[%c0_11, %c0_12], %12 {strides = array<i32>} : memref<8x4xf32, #tpu.memory_space<vmem>>, vector<8x4xf32>,
    return
  }
  func.func @transform_0(%arg0: i32) -> (i32, i32) {
    %c0_i32 = arith.constant 0 : i32
    %c0_i32_0 = arith.constant 0 : i32
    return %arg0, %c0_i32 : i32, i32
  }
  func.func @transform_1(%arg0: i32) -> (i32, i32) {
    %c0_i32 = arith.constant 0 : i32
    %c0_i32_0 = arith.constant 0 : i32
    %c0_i32_1 = arith.constant 0 : i32
    return %c0_i32, %c0_i32_0 : i32, i32
  }
  func.func @transform_2(%arg0: i32) -> (i32, i32) {
    %c0_i32 = arith.constant 0 : i32
    %c0_i32_0 = arith.constant 0 : i32
    %c0_i32_1 = arith.constant 0 : i32
    return %c0_i32, %c0_i32_0 : i32, i32
  }
  func.func @transform_3(%arg0: i32) -> (i32, i32) {
    %c0_i32 = arith.constant 0 : i32
    %c0_i32_0 = arith.constant 0 : i32
    %c0_i32_1 = arith.constant 0 : i32
    return %c0_i32, %c0_i32_0 : i32, i32
  }
  func.func @transform_4(%arg0: i32) -> (i32, i32) {
    %c0_i32 = arith.constant 0 : i32
    %c0_i32_0 = arith.constant 0 : i32
    %c0_i32_1 = arith.constant 0 : i32
    return %c0_i32, %c0_i32_0 : i32, i32
  }
  func.func @transform_5(%arg0: i32) -> (i32, i32) {
    %c0_i32 = arith.constant 0 : i32
    %c0_i32_0 = arith.constant 0 : i32
    return %arg0, %c0_i32 : i32, i32
  }
}

</mosaic_0001>

<bundles_post_ra>
// kernel: tpu_custom_call.1
= control target key start
LH: loop header
LB: loop body
LE: loop exit
PB: predicated region body
PF: predicated region fallthrough
CT: control target
= control target key end

     0   :  { %vm69_vm0 = vcmask 1044480   ;;  %vm70_vm1 = vcmask 1045504   ;;  %v156_v2 = vmov 65535   ;;  %vm65_vm2 = vcmask 613376   ;;  %s223_s1 = inlined_call_operand.vmem [shape: bf16[75,16], index: 1, kind: input, shape index: {}]   ;;  %s224_s2 = inlined_call_operand.vmem [shape: f32[1,16], index: 2, kind: input, shape index: {}]   ;;  %s225_s0 = inlined_call_operand.vmem [shape: bf16[8,75], index: 0, kind: input, shape index: {}]   ;;  %s226_s4 = inlined_call_operand.vmem [shape: f32[1,4], index: 4, kind: input, shape index: {}]   ;;  %s227_s3 = inlined_call_operand.vmem [shape: f32[16,4], index: 3, kind: input, shape index: {}]   ;;  %s228_s5 = inlined_call_operand.vmem [shape: f32[8,4], index: 5, kind: output, shape index: {}]  }
   0x1   :  { %v144_v0 = vld [vmem:[%s223_s1 + $0x20] sm:$0xf]  ;;  %v152_v1 = vld [vmem:[%s223_s1 + $0x20] sm:$0x30]  ;;  %v71_v3 = vsel %vm69_vm0, 4294967295, %v156_v2  ;;  %v151_v7 = vld [vmem:[%s223_s1 + $0x18] sm:$0xff] }
   0x2   :  { %v145_v4 = vor.u32 %v152_v1, %v144_v0  ;;  %v72_v5 = vsel %vm70_vm1, %v71_v3, 0  ;;  %v150_v8 = vld [vmem:[%s223_s1 + $0x10] sm:$0xff]  ;;  %v149_v9 = vld [vmem:[%s223_s1 + $0x8] sm:$0xff]  ;;  %v148_v10 = vld [vmem:[%s223_s1] sm:$0xff]  ;;  %vm96_vm3 = vcmask 130048   ;;  %vm120_vm4 = vcmask 31744  }
   0x3   :  { %v21_v11 = vld [vmem:[%s225_s0] sm:$0xf]  ;;  %v91_v12 = vld [vmem:[%s227_s3 + $0x8] sm:$0xff] }
   0x4   :  { %v74_v6 = vand.u32 %v145_v4, %v72_v5  ;;  %114 = vmatpush.msra.mxu1 %v91_v12  ;;  %v90_v13 = vld [vmem:[%s227_s3] sm:$0xff] }
   0x5   :  { %v154_v14 = vld [vmem:[%s224_s2] ss:$0 sm:$0xff] }
   0x6   :  { %79 = vmatpush.bf16.msra.mxu0 %v74_v6  ;;  %115 = vmatpush.msra.mxu1 %v90_v13  ;;  %v155_v19 = vld [vmem:[%s226_s4] ss:$0 sm:$0xff] }
   0xa   :  { %80 = vmatpush.bf16.msra.mxu0 %v151_v7 }
   0xe   :  { %81 = vmatpush.bf16.msra.mxu0 %v150_v8 }
  0x12   :  { %82 = vmatpush.bf16.msra.mxu0 %v149_v9 }
  0x16   :  { %83 = vmatpush.bf16.msra.mxu0 %v148_v10 }
  0x19   :  { %146 = vmatmul.msk.bf16.vlgmr.msra.gmra.mxu0 %vm65_vm2, %v21_v11 }
  0x96   :  { %v85_v15 = vpop.f32.mrf.mxu0 }
  0x97   :  { %v86_v16 = vadd.f32 %v154_v14, %v85_v15 }
  0x99   :  { %v89_v17 = vmax.f32 %v86_v16, 0.0 }
  0x9b   :  { %147 = vmatmul.msk.f32.vlgmr.msra.gmra.mxu1 %vm96_vm3, %v89_v17 }
  0x9e   :  { %v87_v18 = vpop.f32.mrf.mxu0 }
 0x118   :  { %v117_v20 = vpop.f32.mrf.mxu1 }
 0x119   :  { %v118_v21 = vadd.f32 %v155_v19, %v117_v20 }
 0x11b   :  { %121 = vst.msk [vmem:[%s228_s5] sm:$0xff] %vm120_vm4, %v118_v21 }

</bundles_post_ra>
